<compile_context>
chip_gen: v5e
topology: v5e:2x2
jax: 0.10.0
libtpu: 0.0.40
codegen_flags: <defaults>
</compile_context>

<pallas_src>
import jax
import jax.numpy as jnp
from jax.experimental import pallas as pl
from jax.experimental.pallas import tpu as pltpu

STATE_DIM = 24       # fc1 contraction dim (full-dim block; Mosaic pads layout)
HIDDEN = 256
ACT_DIM = 4
OUT_PAD = 128        # lane-dense fc_mu width for the MXU (sliced before store)


def munet_kernel(x_ref, w1_ref, b1_ref, w2_ref, b2_ref, w3_ref, b3_ref, out_ref):
    # fc1 + ReLU   (bf16 MXU operands, f32 accumulation / elementwise)
    x = x_ref[...].astype(jnp.bfloat16)
    h1 = jnp.dot(x, w1_ref[...], preferred_element_type=jnp.float32)
    h1 = jnp.maximum(h1 + b1_ref[...], 0.0)
    # fc2 + ReLU
    h2 = jnp.dot(h1.astype(jnp.bfloat16), w2_ref[...],
                 preferred_element_type=jnp.float32)
    h2 = jnp.maximum(h2 + b2_ref[...], 0.0)
    # fc_mu on 128 padded lanes (MXU-friendly), then narrow to the 4 real
    # action lanes before bias/tanh/store -> (TB, 4) writeback only.
    mu = jnp.dot(h2.astype(jnp.bfloat16), w3_ref[...],
                 preferred_element_type=jnp.float32)
    out_ref[...] = jnp.tanh(mu[:, :ACT_DIM] + b3_ref[...]).astype(out_ref.dtype)


def init_munet_params(key):
    """Matches torch.nn.Linear default init: U(-1/sqrt(fan_in), 1/sqrt(fan_in)).
    Weights stored as [in, out] (transpose of PyTorch's [out, in])."""
    dims = [(STATE_DIM, HIDDEN), (HIDDEN, HIDDEN), (HIDDEN, ACT_DIM)]
    params = []
    for (fan_in, fan_out) in dims:
        key, kw, kb = jax.random.split(key, 3)
        bound = 1.0 / jnp.sqrt(jnp.float32(fan_in))
        w = jax.random.uniform(kw, (fan_in, fan_out), jnp.float32, -bound, bound)
        b = jax.random.uniform(kb, (1, fan_out), jnp.float32, -bound, bound)
        params.extend([w, b])
    return tuple(params)


def prepare_munet_params(params):
    """One-time conversion to kernel layout: bf16 weights; fc_mu weight padded
    to 128 output lanes (zero columns). Biases stay f32; b3 stays (1, 4)."""
    w1, b1, w2, b2, w3, b3 = params
    w3p = jnp.zeros((HIDDEN, OUT_PAD), jnp.float32).at[:, :ACT_DIM].set(w3)
    return (w1.astype(jnp.bfloat16), b1,
            w2.astype(jnp.bfloat16), b2,
            w3p.astype(jnp.bfloat16), b3)


def _round_up(n, m):
    return ((n + m - 1) // m) * m


def _pick_tile(batch, tile_b):
    """Batch tile: multiple of 16 (bf16 sublane packing), as large as allowed,
    but split into >= 2 grid steps when the batch is big enough so both
    TensorCores get work on v7x."""
    tile_b = max(16, _round_up(tile_b, 16))
    b16 = _round_up(max(batch, 16), 16)
    if b16 >= 64:
        tb = min(tile_b, _round_up((b16 + 1) // 2, 16))
    else:
        tb = b16
    return tb


def munet_forward(x, prepared_params, tile_b=2048):
    """x: [B, 24] float32 -> [B, 4] float32."""
    w1, b1, w2, b2, w3p, b3 = prepared_params
    B = x.shape[0]
    TB = _pick_tile(B, tile_b)
    B_pad = _round_up(B, TB)
    # Only batch rows are padded (and only when B isn't a tile multiple);
    # the feature cast/pad now happens inside the kernel.
    x_p = x if B_pad == B else jnp.pad(x, ((0, B_pad - B), (0, 0)))

    cost = pl.CostEstimate(
        flops=2 * B_pad * (STATE_DIM * HIDDEN + HIDDEN * HIDDEN + HIDDEN * OUT_PAD),
        transcendentals=B_pad * OUT_PAD,
        bytes_accessed=(B_pad * (STATE_DIM + ACT_DIM) * 4
                        + (STATE_DIM * HIDDEN + HIDDEN * HIDDEN + HIDDEN * OUT_PAD) * 2
                        + (2 * HIDDEN + ACT_DIM) * 4),
    )

    out = pl.pallas_call(
        munet_kernel,
        out_shape=jax.ShapeDtypeStruct((B_pad, ACT_DIM), jnp.float32),
        grid=(B_pad // TB,),
        in_specs=[
            pl.BlockSpec((TB, STATE_DIM), lambda i: (i, 0)),      # x tile (pipelined, f32)
            pl.BlockSpec((STATE_DIM, HIDDEN), lambda i: (0, 0)),  # w1 (resident, bf16)
            pl.BlockSpec((1, HIDDEN), lambda i: (0, 0)),          # b1 (f32)
            pl.BlockSpec((HIDDEN, HIDDEN), lambda i: (0, 0)),     # w2
            pl.BlockSpec((1, HIDDEN), lambda i: (0, 0)),          # b2
            pl.BlockSpec((HIDDEN, OUT_PAD), lambda i: (0, 0)),    # w3 (padded lanes)
            pl.BlockSpec((1, ACT_DIM), lambda i: (0, 0)),         # b3 (1, 4)
        ],
        out_specs=pl.BlockSpec((TB, ACT_DIM), lambda i: (i, 0)),  # narrow (TB, 4) store
        compiler_params=pltpu.CompilerParams(
            dimension_semantics=("parallel",),
            vmem_limit_bytes=32 * 1024 * 1024,
        ),
        cost_estimate=cost,
    )(x_p, w1, b1, w2, b2, w3p, b3)
    return out if B_pad == B else out[:B]


def munet_reference_f32(x, params):
    """Pure-f32 reference of the original PyTorch forward."""
    w1, b1, w2, b2, w3, b3 = params
    h1 = jnp.maximum(x @ w1 + b1, 0.0)
    h2 = jnp.maximum(h1 @ w2 + b2, 0.0)
    return jnp.tanh(h2 @ w3 + b3)


def munet_reference_bf16(x, prepared_params):
    """Reference using the same bf16-operand / f32-accumulation recipe."""
    w1, b1, w2, b2, w3p, b3 = prepared_params
    h1 = jnp.maximum(
        jnp.dot(x.astype(jnp.bfloat16), w1, preferred_element_type=jnp.float32) + b1, 0.0)
    h2 = jnp.maximum(
        jnp.dot(h1.astype(jnp.bfloat16), w2, preferred_element_type=jnp.float32) + b2, 0.0)
    mu = jnp.dot(h2.astype(jnp.bfloat16), w3p, preferred_element_type=jnp.float32)
    return jnp.tanh(mu[:, :ACT_DIM] + b3)


if __name__ == "__main__":
    key = jax.random.PRNGKey(0)
    kparam, kx1, kx2 = jax.random.split(key, 3)
    params = init_munet_params(kparam)
    prepared = prepare_munet_params(params)

    # Small RL-style batch (single grid step, TB=16).
    B1 = 8
    x1 = jax.random.normal(kx1, (B1, STATE_DIM), jnp.float32)
    out1 = jax.block_until_ready(munet_forward(x1, prepared))
    assert out1.shape == (B1, ACT_DIM)

    # Non-multiple batch: exercises batch padding + a 2-step grid (TB=160).
    B2 = 300
    x2 = jax.random.normal(kx2, (B2, STATE_DIM), jnp.float32)
    out2 = jax.block_until_ready(munet_forward(x2, prepared))
    assert out2.shape == (B2, ACT_DIM)

    for x, out in ((x1, out1), (x2, out2)):
        # Tight check against a reference using identical bf16/f32 precision.
        ref_bf16 = munet_reference_bf16(x, prepared)
        assert jnp.allclose(out, ref_bf16, atol=2e-3, rtol=2e-3)
        # Loose semantic check against the pure-f32 PyTorch-equivalent forward.
        ref_f32 = munet_reference_f32(x, params)
        assert jnp.allclose(out, ref_f32, atol=5e-2, rtol=5e-2)

    print("KERNEL_OK")
</pallas_src>

<mosaic_0001>
module attributes {stable_mosaic.version = 11 : i64} {
  func.func @munet_kernel(%arg0: i32, %arg1: memref<16x24xf32, #tpu.memory_space<vmem>>, %arg2: memref<24x256xbf16, #tpu.memory_space<vmem>>, %arg3: memref<1x256xf32, #tpu.memory_space<vmem>>, %arg4: memref<256x256xbf16, #tpu.memory_space<vmem>>, %arg5: memref<1x256xf32, #tpu.memory_space<vmem>>, %arg6: memref<256x128xbf16, #tpu.memory_space<vmem>>, %arg7: memref<1x4xf32, #tpu.memory_space<vmem>>, %arg8: memref<16x4xf32, #tpu.memory_space<vmem>>) attributes {dimension_semantics = [#tpu.dimension_semantics<parallel>], iteration_bounds = array<i64: 1>, scalar_prefetch = 0 : i64, scratch_operands = 0 : i64, tpu.core_type = #tpu.core_type<tc>, window_params = [{transform_indices = @transform_0, window_bounds = array<i64: 16, 24>}, {pipeline_mode = #tpu.pipeline_mode<synchronous>, transform_indices = @transform_1, window_bounds = array<i64: 24, 256>}, {pipeline_mode = #tpu.pipeline_mode<synchronous>, transform_indices = @transform_2, window_bounds = array<i64: 1, 256>}, {pipeline_mode = #tpu.pipeline_mode<synchronous>, transform_indices = @transform_3, window_bounds = array<i64: 256, 256>}, {pipeline_mode = #tpu.pipeline_mode<synchronous>, transform_indices = @transform_4, window_bounds = array<i64: 1, 256>}, {pipeline_mode = #tpu.pipeline_mode<synchronous>, transform_indices = @transform_5, window_bounds = array<i64: 256, 128>}, {pipeline_mode = #tpu.pipeline_mode<synchronous>, transform_indices = @transform_6, window_bounds = array<i64: 1, 4>}, {transform_indices = @transform_7, window_bounds = array<i64: 16, 4>}]} {
    %c0 = arith.constant 0 : index
    %c0_0 = arith.constant 0 : index
    %0 = vector.load %arg1[%c0, %c0_0] : memref<16x24xf32, #tpu.memory_space<vmem>>, vector<16x24xf32>
    %1 = arith.truncf %0 : vector<16x24xf32> to vector<16x24xbf16>
    %c0_1 = arith.constant 0 : index
    %c0_2 = arith.constant 0 : index
    %2 = vector.load %arg2[%c0_1, %c0_2] : memref<24x256xbf16, #tpu.memory_space<vmem>>, vector<24x256xbf16>
    %cst = arith.constant dense<0.000000e+00> : vector<16x256xf32>
    %3 = tpu.matmul %1, %2, %cst {dimension_numbers = #tpu.dot_dimension_numbers<[1], [0], [0], [1], [0, 0, 1, 1], [], []>} : vector<16x24xbf16>, vector<24x256xbf16>, vector<16x256xf32> -> vector<16x256xf32>
    %c0_3 = arith.constant 0 : index
    %c0_4 = arith.constant 0 : index
    %4 = vector.load %arg3[%c0_3, %c0_4] : memref<1x256xf32, #tpu.memory_space<vmem>>, vector<1x256xf32>
    %5 = vector.broadcast %4 : vector<1x256xf32> to vector<16x256xf32>
    %6 = arith.addf %3, %5 : vector<16x256xf32>
    %cst_5 = arith.constant 0.000000e+00 : f32
    %7 = vector.broadcast %cst_5 : f32 to vector<16x256xf32>
    %8 = arith.maximumf %6, %7 : vector<16x256xf32>
    %9 = arith.truncf %8 : vector<16x256xf32> to vector<16x256xbf16>
    %c0_6 = arith.constant 0 : index
    %c0_7 = arith.constant 0 : index
    %10 = vector.load %arg4[%c0_6, %c0_7] : memref<256x256xbf16, #tpu.memory_space<vmem>>, vector<256x256xbf16>
    %cst_8 = arith.constant dense<0.000000e+00> : vector<16x256xf32>
    %11 = tpu.matmul %9, %10, %cst_8 {dimension_numbers = #tpu.dot_dimension_numbers<[1], [0], [0], [1], [0, 0, 1, 1], [], []>} : vector<16x256xbf16>, vector<256x256xbf16>, vector<16x256xf32> -> vector<16x256xf32>
    %c0_9 = arith.constant 0 : index
    %c0_10 = arith.constant 0 : index
    %12 = vector.load %arg5[%c0_9, %c0_10] : memref<1x256xf32, #tpu.memory_space<vmem>>, vector<1x256xf32>
    %13 = vector.broadcast %12 : vector<1x256xf32> to vector<16x256xf32>
    %14 = arith.addf %11, %13 : vector<16x256xf32>
    %cst_11 = arith.constant 0.000000e+00 : f32
    %15 = vector.broadcast %cst_11 : f32 to vector<16x256xf32>
    %16 = arith.maximumf %14, %15 : vector<16x256xf32>
    %17 = arith.truncf %16 : vector<16x256xf32> to vector<16x256xbf16>
    %c0_12 = arith.constant 0 : index
    %c0_13 = arith.constant 0 : index
    %18 = vector.load %arg6[%c0_12, %c0_13] : memref<256x128xbf16, #tpu.memory_space<vmem>>, vector<256x128xbf16>
    %cst_14 = arith.constant dense<0.000000e+00> : vector<16x128xf32>
    %19 = tpu.matmul %17, %18, %cst_14 {dimension_numbers = #tpu.dot_dimension_numbers<[1], [0], [0], [1], [0, 0, 1, 1], [], []>} : vector<16x256xbf16>, vector<256x128xbf16>, vector<16x128xf32> -> vector<16x128xf32>
    %20 = vector.extract_strided_slice %19 {offsets = [0, 0], sizes = [16, 4], strides = [1, 1]} : vector<16x128xf32> to vector<16x4xf32>
    %c0_15 = arith.constant 0 : index
    %c0_16 = arith.constant 0 : index
    %21 = vector.load %arg7[%c0_15, %c0_16] : memref<1x4xf32, #tpu.memory_space<vmem>>, vector<1x4xf32>
    %22 = vector.broadcast %21 : vector<1x4xf32> to vector<16x4xf32>
    %23 = arith.addf %20, %22 : vector<16x4xf32>
    %24 = math.tanh %23 : vector<16x4xf32>
    %c0_17 = arith.constant 0 : index
    %c0_18 = arith.constant 0 : index
    %25 = vector.load %arg8[%c0_17, %c0_18] : memref<16x4xf32, #tpu.memory_space<vmem>>, vector<16x4xf32>
    tpu.vector_store %arg8[%c0_17, %c0_18], %24 {strides = array<i32>} : memref<16x4xf32, #tpu.memory_space<vmem>>, vector<16x4xf32>,
    return
  }
  func.func @transform_0(%arg0: i32) -> (i32, i32) {
    %c0_i32 = arith.constant 0 : i32
    %c0_i32_0 = arith.constant 0 : i32
    return %arg0, %c0_i32 : i32, i32
  }
  func.func @transform_1(%arg0: i32) -> (i32, i32) {
    %c0_i32 = arith.constant 0 : i32
    %c0_i32_0 = arith.constant 0 : i32
    %c0_i32_1 = arith.constant 0 : i32
    return %c0_i32, %c0_i32_0 : i32, i32
  }
  func.func @transform_2(%arg0: i32) -> (i32, i32) {
    %c0_i32 = arith.constant 0 : i32
    %c0_i32_0 = arith.constant 0 : i32
    %c0_i32_1 = arith.constant 0 : i32
    return %c0_i32, %c0_i32_0 : i32, i32
  }
  func.func @transform_3(%arg0: i32) -> (i32, i32) {
    %c0_i32 = arith.constant 0 : i32
    %c0_i32_0 = arith.constant 0 : i32
    %c0_i32_1 = arith.constant 0 : i32
    return %c0_i32, %c0_i32_0 : i32, i32
  }
  func.func @transform_4(%arg0: i32) -> (i32, i32) {
    %c0_i32 = arith.constant 0 : i32
    %c0_i32_0 = arith.constant 0 : i32
    %c0_i32_1 = arith.constant 0 : i32
    return %c0_i32, %c0_i32_0 : i32, i32
  }
  func.func @transform_5(%arg0: i32) -> (i32, i32) {
    %c0_i32 = arith.constant 0 : i32
    %c0_i32_0 = arith.constant 0 : i32
    %c0_i32_1 = arith.constant 0 : i32
    return %c0_i32, %c0_i32_0 : i32, i32
  }
  func.func @transform_6(%arg0: i32) -> (i32, i32) {
    %c0_i32 = arith.constant 0 : i32
    %c0_i32_0 = arith.constant 0 : i32
    %c0_i32_1 = arith.constant 0 : i32
    return %c0_i32, %c0_i32_0 : i32, i32
  }
  func.func @transform_7(%arg0: i32) -> (i32, i32) {
    %c0_i32 = arith.constant 0 : i32
    %c0_i32_0 = arith.constant 0 : i32
    return %arg0, %c0_i32 : i32, i32
  }
}

</mosaic_0001>

<bundles_post_ra>
// kernel: tpu_custom_call.1
= control target key start
LH: loop header
LB: loop body
LE: loop exit
PB: predicated region body
PF: predicated region fallthrough
CT: control target
= control target key end

     0   :  { %12 = vsyncpa [#allocation3], 0  ;;  %s1079_s0 = inlined_call_operand.hbm [shape: f32[16,24], index: 0, kind: input, shape index: {}]   ;;  %s1080_s1 = inlined_call_operand.hbm [shape: bf16[24,256], index: 1, kind: input, shape index: {}]   ;;  %s1081_s2 = inlined_call_operand.hbm [shape: f32[1,256], index: 2, kind: input, shape index: {}]   ;;  %s1082_s3 = inlined_call_operand.hbm [shape: bf16[256,256], index: 3, kind: input, shape index: {}]   ;;  %s1083_s4 = inlined_call_operand.vmem [shape: f32[1,256], index: 4, kind: input, shape index: {}]   ;;  %s1084_s5 = inlined_call_operand.hbm [shape: bf16[256,128], index: 5, kind: input, shape index: {}]   ;;  %s1085_s6 = inlined_call_operand.vmem [shape: f32[1,4], index: 6, kind: input, shape index: {}]   ;;  %s1086_s7 = inlined_call_operand.vmem [shape: f32[16,4], index: 7, kind: output, shape index: {}]  }
   0x1   :  { %13 = vsyncpa [#allocation5], 0 }
   0x2   :  { %14 = vsyncpa [#allocation8], 0  ;;  %s32_s26 = sshll.u32 %s1080_s1, 4  ;;  %s1001_s27 = smov [#allocation4]   ;;  %s33_s26 = int_to_ptr.hbm [resolvable:$true] %s32_s26 }
   0x3   :  { %s34_s28 = sshll.u32 %s1001_s27, 4  ;;  %s56_s8 = sshll.u32 %s1082_s3, 4  ;;  %s35_s28 = int_to_ptr.vmem [resolvable:$true] %s34_s28  ;;  %s57_s8 = int_to_ptr.hbm [resolvable:$true] %s56_s8 }
   0x4   :  { %s1002_s9 = smov 128   ;;  %s1003_s10 = smov 8  }
   0x5   :  { %40 = dma.hbm_to_vmem [thread:$0]  %s33_s26, 384, %s35_s28, [#allocation5], %s1002_s9, %s1002_s9, %s1003_s10  }
   0x6   :  { %s1004_s11 = smov [#allocation7]   ;;  %s19_s15 = sshll.u32 %s1079_s0, 4  ;;  %s20_s15 = int_to_ptr.hbm [resolvable:$true] %s19_s15 }
   0x7   :  { %s58_s12 = sshll.u32 %s1004_s11, 4  ;;  %s46_s17 = sshll.u32 %s1081_s2, 4  ;;  %s59_s12 = int_to_ptr.vmem [resolvable:$true] %s58_s12  ;;  %s47_s17 = int_to_ptr.hbm [resolvable:$true] %s46_s17 }
   0x8   :  { %64 = dma.hbm_to_vmem [thread:$0]  %s57_s8, 4096, %s59_s12, [#allocation8], %s1002_s9, %s1002_s9, %s1003_s10  }
   0x9   :  { %s1005_s18 = smov [#allocation2]   ;;  %s1006_s3 = smov [#allocation6]  }
   0xa   :  { %s21_s19 = sshll.u32 %s1005_s18, 4  ;;  %s48_s20 = sshll.u32 %s1006_s3, 4  ;;  %s22_s19 = int_to_ptr.vmem [resolvable:$true] %s21_s19  ;;  %s49_s20 = int_to_ptr.vmem [resolvable:$true] %s48_s20 }
   0xb   :  { %27 = dma.hbm_to_vmem [thread:$0]  %s20_s15, 256, %s22_s19, [#allocation3], %s1002_s9, %s1002_s9, %s1003_s10  }
   0xc   :  { %s71_s23 = sshll.u32 %s1084_s5, 4  ;;  %s1007_s0 = smov [#allocation9]   ;;  %s72_s23 = int_to_ptr.hbm [resolvable:$true] %s71_s23 }
   0xd   :  { %51 = dma.hbm_to_vmem [thread:$0]  %s47_s17, 32, %s49_s20, [#allocation5]  }
   0xe   :  { %s73_s24 = sshll.u32 %s1007_s0, 4  ;;  %s1008_s25 = smov 64   ;;  %s74_s24 = int_to_ptr.vmem [resolvable:$true] %s73_s24 }
   0xf   :  { %s1009_s26 = smov 4  }
  0x10   :  { %79 = dma.hbm_to_vmem [thread:$0]  %s72_s23, 2048, %s74_s24, [#allocation8], %s1008_s25, %s1008_s25, %s1009_s26  }
  0x11   :  { %995 = dma.done.wait [#allocation3], 256  }
  0x12   :  { %996 = vsyncadd [#allocation3], 4294967040 }
  0x13   :  { %997 = dma.done.wait [#allocation5], 416  }
  0x14   :  { %998 = vsyncadd [#allocation5], 4294966880 }
  0x15   :  { %999 = dma.done.wait [#allocation8], 6144  }
  0x16   :  { %1000 = vsyncadd [#allocation8], 4294961152  ;;  %v108_v0 = vld [vmem:[#allocation4 + $0x10] sm:$0xff]  ;;  %vm134_vm0 = vcmask 1043456   ;;  %v611_v3 = vld [vmem:[#allocation4] sm:$0xf] }
  0x17   :  { %v122_v1 = vunpack.c.l.b16 %v108_v0  ;;  %v123_v2 = vunpack.c.h.b16 %v108_v0  ;;  %v812_v4 = vld [vmem:[#allocation4 + $0x4] sm:$0xf0]  ;;  %v811_v5 = vld [vmem:[#allocation4 + $0x4] sm:$0xf]  ;;  %v613_v6 = vld [vmem:[#allocation4 + $0x8] sm:$0xf0] }
  0x18   :  { %v677_v7 = vld [vmem:[#allocation7 + $0x70] sm:$0xf]  ;;  %v828_v8 = vld [vmem:[#allocation7 + $0x74] sm:$0xf0]  ;;  %v827_v14 = vld [vmem:[#allocation7 + $0x74] sm:$0xf]  ;;  %v612_v24 = vor.u32 %v812_v4, %v611_v3  ;;  %v616_v25 = vor.u32 %v811_v5, %v613_v6 }
  0x19   :  { %v126_v9 = vpack.c.b16 %v122_v1, %v122_v1  ;;  %v127_v10 = vpack.c.b16 %v123_v2, %v123_v2  ;;  %v678_v11 = vor.u32 %v828_v8, %v677_v7  ;;  %v741_v12 = vld [vmem:[#allocation7 + $0xf0] sm:$0xf]  ;;  %v844_v13 = vld [vmem:[#allocation7 + $0xf4] sm:$0xf0]  ;;  %v679_v17 = vld [vmem:[#allocation7 + $0x78] sm:$0xf0] }
  0x1a   :  { %v103_v15 = vld [vmem:[#allocation2] sm:$0xff]  ;;  %v742_v16 = vor.u32 %v844_v13, %v741_v12  ;;  %v669_v22 = vld [vmem:[#allocation7 + $0x60] sm:$0xf]  ;;  %v826_v23 = vld [vmem:[#allocation7 + $0x64] sm:$0xf0]  ;;  %v682_v30 = vor.u32 %v827_v14, %v679_v17  ;;  %vm130_vm1 = vcmask 195584  }
  0x1b   :  { %v843_v18 = vld [vmem:[#allocation7 + $0xf4] sm:$0xf]  ;;  %v743_v19 = vld [vmem:[#allocation7 + $0xf8] sm:$0xf0]  ;;  %v136_v20 = vsel %vm134_vm0, %v126_v9, 0  ;;  %v139_v21 = vsel %vm134_vm0, %v127_v10, 0  ;;  %373 = vmatpush.bf16.msra.mxu2 %v678_v11  ;;  %v670_v27 = vor.u32 %v826_v23, %v669_v22 }
  0x1c   :  { %147 = vmatpush.bf16.msra.mxu0 %v136_v20  ;;  %161 = vmatpush.bf16.msra.mxu1 %v139_v21  ;;  %v104_v26 = vld [vmem:[#allocation2 + $0x8] sm:$0xff]  ;;  %v842_v29 = vld [vmem:[#allocation7 + $0xe4] sm:$0xf0]  ;;  %v746_v31 = vor.u32 %v843_v18, %v743_v19  ;;  %v671_v33 = vld [vmem:[#allocation7 + $0x68] sm:$0xf0]  ;;  %vm599_vm2 = vcmask 31744  }
  0x1d   :  { %v733_v28 = vld [vmem:[#allocation7 + $0xe0] sm:$0xf]  ;;  %387 = vmatpush.bf16.msra.mxu3 %v742_v16  ;;  %v825_v32 = vld [vmem:[#allocation7 + $0x64] sm:$0xf]  ;;  %v735_v36 = vld [vmem:[#allocation7 + $0xe8] sm:$0xf0]  ;;  %v105_v39 = vpack.c.bf16 %v104_v26, %v103_v15 }
  0x1e   :  { %v841_v34 = vld [vmem:[#allocation7 + $0xe4] sm:$0xf]  ;;  %v734_v35 = vor.u32 %v842_v29, %v733_v28  ;;  %v661_v37 = vld [vmem:[#allocation7 + $0x50] sm:$0xf]  ;;  %v824_v38 = vld [vmem:[#allocation7 + $0x54] sm:$0xf0]  ;;  %v674_v43 = vor.u32 %v825_v32, %v671_v33 }
  0x1f   :  { %374 = vmatpush.bf16.msra.mxu2 %v670_v27  ;;  %v725_v40 = vld [vmem:[#allocation7 + $0xd0] sm:$0xf]  ;;  %v840_v41 = vld [vmem:[#allocation7 + $0xd4] sm:$0xf0]  ;;  %v662_v42 = vor.u32 %v824_v38, %v661_v37  ;;  %v738_v44 = vor.u32 %v841_v34, %v735_v36  ;;  %v823_v45 = vld [vmem:[#allocation7 + $0x54] sm:$0xf] }
  0x20   :  { %148 = vmatpush.bf16.msra.mxu0 %v612_v24  ;;  %162 = vmatpush.bf16.msra.mxu1 %v616_v25  ;;  %v653_v46 = vld [vmem:[#allocation7 + $0x40] sm:$0xf]  ;;  %v822_v47 = vld [vmem:[#allocation7 + $0x44] sm:$0xf0]  ;;  %v726_v48 = vor.u32 %v840_v41, %v725_v40  ;;  %v663_v49 = vld [vmem:[#allocation7 + $0x58] sm:$0xf0] }
  0x21   :  { %388 = vmatpush.bf16.msra.mxu3 %v734_v35  ;;  %v839_v50 = vld [vmem:[#allocation7 + $0xd4] sm:$0xf]  ;;  %v727_v51 = vld [vmem:[#allocation7 + $0xd8] sm:$0xf0]  ;;  %v717_v52 = vld [vmem:[#allocation7 + $0xc0] sm:$0xf]  ;;  %v654_v54 = vor.u32 %v822_v47, %v653_v46  ;;  %v666_v55 = vor.u32 %v823_v45, %v663_v49 }
  0x22   :  { %v838_v53 = vld [vmem:[#allocation7 + $0xc4] sm:$0xf0]  ;;  %v730_v56 = vor.u32 %v839_v50, %v727_v51  ;;  %v821_v57 = vld [vmem:[#allocation7 + $0x44] sm:$0xf]  ;;  %v655_v59 = vld [vmem:[#allocation7 + $0x48] sm:$0xf0] }
  0x23   :  { %617 = vmatmul.msk.bf16.vlgmr.msra.gmra.mxu0 %vm130_vm1, %v105_v39  ;;  %618 = vmatmul.msk.bf16.vlgmr.msra.gmra.mxu1 %vm130_vm1, %v105_v39  ;;  %v718_v58 = vor.u32 %v838_v53, %v717_v52  ;;  %v837_v60 = vld [vmem:[#allocation7 + $0xc4] sm:$0xf]  ;;  %v719_v61 = vld [vmem:[#allocation7 + $0xc8] sm:$0xf0]  ;;  %v658_v62 = vor.u32 %v821_v57, %v655_v59  ;;  %v645_v0 = vld [vmem:[#allocation7 + $0x30] sm:$0xf] }
  0x24   :  { %401 = vmatpush.bf16.msrb.mxu0 %v682_v30  ;;  %415 = vmatpush.bf16.msrb.mxu1 %v746_v31  ;;  %v722_v63 = vor.u32 %v837_v60, %v719_v61  ;;  %v820_v1 = vld [vmem:[#allocation7 + $0x34] sm:$0xf0]  ;;  %v709_v2 = vld [vmem:[#allocation7 + $0xb0] sm:$0xf]  ;;  %v819_v5 = vld [vmem:[#allocation7 + $0x34] sm:$0xf] }
  0x25   :  { %375 = vmatpush.bf16.msra.mxu2 %v662_v42  ;;  %389 = vmatpush.bf16.msra.mxu3 %v726_v48  ;;  %v646_v3 = vor.u32 %v820_v1, %v645_v0  ;;  %v836_v4 = vld [vmem:[#allocation7 + $0xb4] sm:$0xf0]  ;;  %v647_v6 = vld [vmem:[#allocation7 + $0x38] sm:$0xf0]  ;;  %v835_v9 = vld [vmem:[#allocation7 + $0xb4] sm:$0xf] }
  0x26   :  { %v710_v7 = vor.u32 %v836_v4, %v709_v2  ;;  %v650_v8 = vor.u32 %v819_v5, %v647_v6  ;;  %v711_v10 = vld [vmem:[#allocation7 + $0xb8] sm:$0xf0]  ;;  %v637_v12 = vld [vmem:[#allocation7 + $0x20] sm:$0xf]  ;;  %v818_v13 = vld [vmem:[#allocation7 + $0x24] sm:$0xf0] }
  0x27   :  { %v714_v11 = vor.u32 %v835_v9, %v711_v10  ;;  %v638_v14 = vor.u32 %v818_v13, %v637_v12  ;;  %v701_v15 = vld [vmem:[#allocation7 + $0xa0] sm:$0xf]  ;;  %v834_v16 = vld [vmem:[#allocation7 + $0xa4] sm:$0xf0]  ;;  %v817_v17 = vld [vmem:[#allocation7 + $0x24] sm:$0xf] }
  0x28   :  { %402 = vmatpush.bf16.msrb.mxu0 %v674_v43  ;;  %416 = vmatpush.bf16.msrb.mxu1 %v738_v44  ;;  %v702_v18 = vor.u32 %v834_v16, %v701_v15  ;;  %v639_v19 = vld [vmem:[#allocation7 + $0x28] sm:$0xf0]  ;;  %v833_v20 = vld [vmem:[#allocation7 + $0xa4] sm:$0xf]  ;;  %v629_v24 = vld [vmem:[#allocation7 + $0x10] sm:$0xf] }
  0x29   :  { %376 = vmatpush.bf16.msra.mxu2 %v654_v54  ;;  %390 = vmatpush.bf16.msra.mxu3 %v718_v58  ;;  %v703_v21 = vld [vmem:[#allocation7 + $0xa8] sm:$0xf0]  ;;  %v642_v22 = vor.u32 %v817_v17, %v639_v19  ;;  %v816_v25 = vld [vmem:[#allocation7 + $0x14] sm:$0xf0]  ;;  %v693_v26 = vld [vmem:[#allocation7 + $0x90] sm:$0xf] }
  0x2a   :  { %v706_v23 = vor.u32 %v833_v20, %v703_v21  ;;  %v630_v27 = vor.u32 %v816_v25, %v629_v24  ;;  %v832_v28 = vld [vmem:[#allocation7 + $0x94] sm:$0xf0]  ;;  %v815_v29 = vld [vmem:[#allocation7 + $0x14] sm:$0xf]  ;;  %v631_v30 = vld [vmem:[#allocation7 + $0x18] sm:$0xf0] }
  0x2b   :  { %v694_v31 = vor.u32 %v832_v28, %v693_v26  ;;  %v634_v32 = vor.u32 %v815_v29, %v631_v30  ;;  %v831_v33 = vld [vmem:[#allocation7 + $0x94] sm:$0xf]  ;;  %v695_v34 = vld [vmem:[#allocation7 + $0x98] sm:$0xf0]  ;;  %v621_v36 = vld [vmem:[#allocation7] sm:$0xf] }
  0x2c   :  { %403 = vmatpush.bf16.msrb.mxu0 %v666_v55  ;;  %417 = vmatpush.bf16.msrb.mxu1 %v730_v56  ;;  %v698_v35 = vor.u32 %v831_v33, %v695_v34  ;;  %v814_v37 = vld [vmem:[#allocation7 + $0x4] sm:$0xf0]  ;;  %v685_v38 = vld [vmem:[#allocation7 + $0x80] sm:$0xf]  ;;  %v813_v41 = vld [vmem:[#allocation7 + $0x4] sm:$0xf] }
  0x2d   :  { %377 = vmatpush.bf16.msra.mxu2 %v646_v3  ;;  %391 = vmatpush.bf16.msra.mxu3 %v710_v7  ;;  %v622_v39 = vor.u32 %v814_v37, %v621_v36  ;;  %v830_v40 = vld [vmem:[#allocation7 + $0x84] sm:$0xf0]  ;;  %v623_v42 = vld [vmem:[#allocation7 + $0x8] sm:$0xf0]  ;;  %v829_v45 = vld [vmem:[#allocation7 + $0x84] sm:$0xf] }
  0x2e   :  { %v686_v43 = vor.u32 %v830_v40, %v685_v38  ;;  %v626_v44 = vor.u32 %v813_v41, %v623_v42  ;;  %v687_v46 = vld [vmem:[#allocation7 + $0x88] sm:$0xf0]  ;;  %v860_v48 = vld [vmem:[#allocation9 + $0x78] sm:$0xff]  ;;  %v859_v50 = vld [vmem:[#allocation9 + $0x70] sm:$0xff] }
  0x2f   :  { %v690_v47 = vor.u32 %v829_v45, %v687_v46  ;;  %v852_v49 = vld [vmem:[#allocation9 + $0x38] sm:$0xff]  ;;  %v851_v51 = vld [vmem:[#allocation9 + $0x30] sm:$0xff]  ;;  %v858_v52 = vld [vmem:[#allocation9 + $0x68] sm:$0xff] }
  0x30   :  { %404 = vmatpush.bf16.msrb.mxu0 %v658_v62  ;;  %418 = vmatpush.bf16.msrb.mxu1 %v722_v63  ;;  %v857_v53 = vld [vmem:[#allocation9 + $0x60] sm:$0xff]  ;;  %v109_v54 = vld [vmem:[#allocation6] sm:$0x3]  ;;  %v850_v7 = vld [vmem:[#allocation9 + $0x28] sm:$0xff] }
  0x31   :  { %378 = vmatpush.bf16.msra.mxu2 %v638_v14  ;;  %392 = vmatpush.bf16.msra.mxu3 %v702_v18  ;;  %v111_v57 = vperm.slane %v109_v54, 0  ;;  %v112_v58 = vperm.slane %v109_v54, 1  ;;  %v849_v9 = vld [vmem:[#allocation9 + $0x20] sm:$0xff]  ;;  %v855_v10 = vld [vmem:[#allocation9 + $0x50] sm:$0xff]  ;;  %v854_v12 = vld [vmem:[#allocation9 + $0x48] sm:$0xff] }
  0x32   :  { %v847_v13 = vld [vmem:[#allocation9 + $0x10] sm:$0xff]  ;;  %v853_v14 = vld [vmem:[#allocation9 + $0x40] sm:$0xff]  ;;  %v846_v15 = vld [vmem:[#allocation9 + $0x8] sm:$0xff] }
  0x33   :  { %v845_v16 = vld [vmem:[#allocation9] sm:$0xff]  ;;  %v207_v17 = vld [vmem:[%s1083_s4] sm:$0x3] }
  0x34   :  { %405 = vmatpush.bf16.msrb.mxu0 %v650_v8  ;;  %419 = vmatpush.bf16.msrb.mxu1 %v714_v11  ;;  %v856_v8 = vld [vmem:[#allocation9 + $0x58] sm:$0xff]  ;;  %v210_v20 = vperm.slane %v207_v17, 1  ;;  %v209_v24 = vperm.slane %v207_v17, 0 }
  0x35   :  { %379 = vmatpush.bf16.msra.mxu2 %v630_v27  ;;  %393 = vmatpush.bf16.msra.mxu3 %v694_v31  ;;  %v848_v11 = vld [vmem:[#allocation9 + $0x18] sm:$0xff] }
  0x38   :  { %406 = vmatpush.bf16.msrb.mxu0 %v642_v22  ;;  %420 = vmatpush.bf16.msrb.mxu1 %v706_v23 }
  0x39   :  { %380 = vmatpush.bf16.msra.mxu2 %v622_v39  ;;  %394 = vmatpush.bf16.msra.mxu3 %v686_v43  ;;  %v870_v43 = vld [vmem:[%s1085_s6] ss:$0 sm:$0xff] }
  0x3c   :  { %407 = vmatpush.bf16.msrb.mxu0 %v634_v32  ;;  %421 = vmatpush.bf16.msrb.mxu1 %v698_v35 }
  0x3d   :  { %577 = vmatpush.bf16.msrb.mxu3 %v860_v48  ;;  %563 = vmatpush.bf16.msrb.mxu2 %v852_v49 }
  0x40   :  { %408 = vmatpush.bf16.msrb.mxu0 %v626_v44  ;;  %422 = vmatpush.bf16.msrb.mxu1 %v690_v47 }
  0x41   :  { %578 = vmatpush.bf16.msrb.mxu3 %v859_v50  ;;  %564 = vmatpush.bf16.msrb.mxu2 %v851_v51 }
  0x45   :  { %579 = vmatpush.bf16.msrb.mxu3 %v858_v52  ;;  %565 = vmatpush.bf16.msrb.mxu2 %v850_v7 }
  0x49   :  { %580 = vmatpush.bf16.msrb.mxu3 %v857_v53  ;;  %566 = vmatpush.bf16.msrb.mxu2 %v849_v9 }
  0x4d   :  { %581 = vmatpush.bf16.msrb.mxu3 %v856_v8  ;;  %567 = vmatpush.bf16.msrb.mxu2 %v848_v11 }
  0x51   :  { %582 = vmatpush.bf16.msrb.mxu3 %v855_v10  ;;  %568 = vmatpush.bf16.msrb.mxu2 %v847_v13 }
  0x55   :  { %583 = vmatpush.bf16.msrb.mxu3 %v854_v12  ;;  %569 = vmatpush.bf16.msrb.mxu2 %v846_v15 }
  0x59   :  { %584 = vmatpush.bf16.msrb.mxu3 %v853_v14  ;;  %570 = vmatpush.bf16.msrb.mxu2 %v845_v16 }
  0xa0   :  { %v150_v55 = vpop.f32.mrf.mxu0  ;;  %v164_v56 = vpop.f32.mrf.mxu1 }
  0xa1   :  { %v151_v59 = vadd.f32 %v150_v55, %v111_v57  ;;  %v165_v60 = vadd.f32 %v164_v56, %v112_v58 }
  0xa3   :  { %v169_v1 = vmax.f32 %v151_v59, 0.0  ;;  %v170_v2 = vmax.f32 %v165_v60, 0.0 }
  0xa8   :  { %v152_v61 = vpop.f32.mrf.mxu0  ;;  %v166_v62 = vpop.f32.mrf.mxu1 }
  0xa9   :  { %v153_v63 = vadd.f32 %v152_v61, %v111_v57  ;;  %v167_v0 = vadd.f32 %v166_v62, %v112_v58 }
  0xab   :  { %v171_v3 = vmax.f32 %v153_v63, 0.0  ;;  %v172_v4 = vmax.f32 %v167_v0, 0.0 }
  0xad   :  { %v173_v5 = vpack.c.bf16 %v171_v3, %v169_v1  ;;  %v174_v6 = vpack.c.bf16 %v172_v4, %v170_v2 }
  0xaf   :  { %381 = vmatmul.bf16.vlgmr.msra.gmra.mxu2 %v173_v5  ;;  %395 = vmatmul.bf16.vlgmr.msra.gmra.mxu3 %v174_v6 }
  0xb0   :  { %409 = vmatmul.bf16.vlgmr.msrb.gmra.mxu0 %v173_v5  ;;  %423 = vmatmul.bf16.vlgmr.msrb.gmra.mxu1 %v174_v6 }
 0x12d   :  { %v410_v18 = vpop.f32.mrf.mxu0  ;;  %v424_v19 = vpop.f32.mrf.mxu1 }
 0x12e   :  { %v411_v21 = vadd.f32 %v410_v18, %v210_v20 }
 0x130   :  { %v425_v26 = vadd.f32 %v424_v19, %v411_v21 }
 0x132   :  { %v382_v22 = vpop.f32.mrf.mxu2  ;;  %v396_v23 = vpop.f32.mrf.mxu3  ;;  %v430_v31 = vmax.f32 %v425_v26, 0.0 }
 0x133   :  { %v383_v28 = vadd.f32 %v382_v22, %v209_v24 }
 0x135   :  { %v412_v25 = vpop.f32.mrf.mxu0  ;;  %v426_v29 = vpop.f32.mrf.mxu1  ;;  %v397_v34 = vadd.f32 %v396_v23, %v383_v28 }
 0x136   :  { %v413_v27 = vadd.f32 %v412_v25, %v210_v20 }
 0x137   :  { %v429_v39 = vmax.f32 %v397_v34, 0.0 }
 0x138   :  { %v427_v30 = vadd.f32 %v426_v29, %v413_v27 }
 0x13a   :  { %v432_v32 = vmax.f32 %v427_v30, 0.0  ;;  %v384_v33 = vpop.f32.mrf.mxu2  ;;  %v398_v37 = vpop.f32.mrf.mxu3 }
 0x13b   :  { %v385_v35 = vadd.f32 %v384_v33, %v209_v24 }
 0x13c   :  { %v434_v36 = vpack.c.bf16 %v432_v32, %v430_v31 }
 0x13d   :  { %v399_v38 = vadd.f32 %v398_v37, %v385_v35 }
 0x13e   :  { %585 = vmatmul.bf16.vlgmr.msrb.gmra.mxu3 %v434_v36 }
 0x13f   :  { %v431_v40 = vmax.f32 %v399_v38, 0.0 }
 0x141   :  { %v433_v41 = vpack.c.bf16 %v431_v40, %v429_v39 }
 0x143   :  { %571 = vmatmul.bf16.vlgmr.msrb.gmra.mxu2 %v433_v41 }
 0x1c1   :  { %v586_v42 = vpop.f32.mrf.mxu3 }
 0x1c6   :  { %v572_v44 = vpop.f32.mrf.mxu2 }
 0x1c7   :  { %v587_v45 = vadd.f32 %v586_v42, %v572_v44 }
 0x1c9   :  { %v595_v46 = vadd.f32 %v870_v43, %v587_v45  ;;  %v588_v47 = vpop.f32.mrf.mxu3 }
 0x1cb   :  { %871 = vtanh.f32 %v595_v46 }
 0x1ce   :  { %v574_v48 = vpop.f32.mrf.mxu2 }
 0x1cf   :  { %v589_v49 = vadd.f32 %v588_v47, %v574_v48 }
 0x1d1   :  { %v872_v50 = vpop.eup %871  ;;  %v596_v51 = vadd.f32 %v870_v43, %v589_v49 }
 0x1d2   :  { %600 = vst.msk [vmem:[%s1086_s7] sm:$0xff] %vm599_vm2, %v872_v50 }
 0x1d3   :  { %873 = vtanh.f32 %v596_v51 }
 0x1d9   :  { %v874_v52 = vpop.eup %873 }
 0x1da   :  { %601 = vst.msk [vmem:[%s1086_s7 + $0x8] sm:$0xff] %vm599_vm2, %v874_v52 }
 0x1db   :  { %606 = vsyncpa [#allocation3], 1 }
 0x1dc   :  { %607 = vsyncpa [#allocation5], 1 }
 0x1dd   :  { %608 = vsyncpa [#allocation8], 1 }

</bundles_post_ra>
